<compile_context>
chip_gen: v5e
topology: v5e:2x2
jax: 0.10.0
libtpu: 0.0.40
codegen_flags: <defaults>
</compile_context>

<pallas_src>
import jax
import jax.numpy as jnp
from jax import lax
from jax.experimental import pallas as pl
from jax.experimental.pallas import tpu as pltpu

# Module defaults (RationaleLoss.__init__).
LAMBDA_SPARSITY = 0.1
LAMBDA_LASSO = 0.5
EPS = 1e-9

# Lanes of the packed accumulator output (sublane 0 of the (8, 128) block).
LANE_CE, LANE_L0, LANE_LASSO, LANE_A, LANE_B = range(5)


def _make_kernel(total_b, block_b, t_orig, t_pad, include_ab):
    """Build the batch-tiled partial-sum kernel."""

    def kernel(preds_ref, targets_ref, pdf0_ref, mask_ref, *rest):
        if include_ab:
            a_ref, b_ref, out_ref, acc_ce, acc_l0, acc_lasso, acc_a, acc_b = rest
        else:
            out_ref, acc_ce, acc_l0, acc_lasso = rest
            a_ref = b_ref = acc_a = acc_b = None

        c = pl.program_id(0)          # "parallel" split (megacore on v7x)
        j = pl.program_id(1)          # "arbitrary" reduction step
        steps = pl.num_programs(1)

        @pl.when(j == 0)
        def _():
            acc_ce[...] = jnp.zeros_like(acc_ce)
            acc_l0[...] = jnp.zeros_like(acc_l0)
            acc_lasso[...] = jnp.zeros_like(acc_lasso)
            if include_ab:
                acc_a[...] = jnp.zeros_like(acc_a)
                acc_b[...] = jnp.zeros_like(acc_b)

        # Native-dtype loads, upcast in-register (bf16 inputs halve HBM traffic).
        preds = preds_ref[...].astype(jnp.float32)      # [TB, C]
        tgt = targets_ref[...]                          # [TB, 1] int32
        pdf0_raw = pdf0_ref[...].astype(jnp.float32)    # [TB, T_pad]
        mask = mask_ref[...].astype(jnp.float32)        # [TB, T_pad]  (binary)

        tb, num_classes = preds.shape

        # Rows past the true batch (zero padding added by the wrapper) contribute 0.
        row = lax.broadcasted_iota(jnp.int32, (tb, 1), 0)
        block_idx = c * steps + j
        valid = ((block_idx * block_b + row) < total_b).astype(jnp.float32)   # [TB,1]

        # ---- cross entropy partial sum (target gather via one-hot select) ----
        row_max = jnp.max(preds, axis=1, keepdims=True)
        lse = jnp.log(jnp.sum(jnp.exp(preds - row_max), axis=1, keepdims=True)) + row_max
        col = lax.broadcasted_iota(jnp.int32, (tb, num_classes), 1)
        tgt_logit = jnp.sum(jnp.where(col == tgt, preds, 0.0), axis=1, keepdims=True)
        acc_ce[...] += jnp.sum((lse - tgt_logit) * valid, axis=0, keepdims=True)

        # ---- L0 sparsity (RationaleLoss._l0_regularize), binary-mask contract ----
        lengths = jnp.sum(mask, axis=1, keepdims=True)                        # [TB,1]
        # One shared EXACT reciprocal for both regularizers (approx would break the
        # 1e-5 tolerance); `valid` folded in so padded rows contribute exactly zero.
        inv_len = pl.reciprocal(lengths + EPS) * valid                        # [TB,1]
        pdf0 = pdf0_raw * mask                                                # [TB,T_pad]
        pdf_nz = mask - pdf0                                                  # [TB,T_pad]
        acc_l0[...] += jnp.sum(jnp.sum(pdf_nz, axis=1, keepdims=True) * inv_len,
                               axis=0, keepdims=True)

        # ---- fused lasso (RationaleLoss._l1_regularize) via lane-aligned XLU roll ----
        # shift = t_pad - 1 == -1 (mod t_pad): neighbour t+1 brought to position t.
        shift = t_pad - 1
        pdf_nz_next = pltpu.roll(pdf_nz, shift=shift, axis=1)
        pdf0_next = pltpu.roll(pdf0, shift=shift, axis=1)
        lasso_terms = pdf0 * pdf_nz_next + pdf_nz * pdf0_next
        lasso_row = jnp.sum(lasso_terms, axis=1, keepdims=True)               # [TB,1]
        if t_pad == t_orig:
            # No zero pad column to absorb the circular wrap: subtract the spurious
            # (first, last) pair explicitly (direction-agnostic, same value either way).
            wrap = (pdf0[:, 0:1] * pdf_nz[:, t_pad - 1:t_pad]
                    + pdf_nz[:, 0:1] * pdf0[:, t_pad - 1:t_pad])
            lasso_row = lasso_row - wrap
        acc_lasso[...] += jnp.sum(lasso_row * inv_len, axis=0, keepdims=True)

        if include_ab:
            a = a_ref[...].astype(jnp.float32)
            b = b_ref[...].astype(jnp.float32)
            acc_a[...] += jnp.sum(jnp.sum(a, axis=1, keepdims=True) * valid,
                                  axis=0, keepdims=True)
            acc_b[...] += jnp.sum(jnp.sum(b, axis=1, keepdims=True) * valid,
                                  axis=0, keepdims=True)

        # ---- pack & store the per-split sums ONCE, at the last reduction step ----
        @pl.when(j == steps - 1)
        def _():
            lane = lax.broadcasted_iota(jnp.int32, (8, 128), 1)
            sub = lax.broadcasted_iota(jnp.int32, (8, 128), 0)
            row0 = sub == 0

            def put(idx, acc):  # place the (1,1) scalar into sublane 0, lane `idx`
                return jnp.where(row0 & (lane == idx), acc[...], 0.0)

            packed = (put(LANE_CE, acc_ce) + put(LANE_L0, acc_l0)
                      + put(LANE_LASSO, acc_lasso))
            if include_ab:
                packed = packed + put(LANE_A, acc_a) + put(LANE_B, acc_b)
            out_ref[...] = packed

    return kernel


def _tpu_vmem_capacity():
    try:
        return int(getattr(pltpu.get_tpu_info(), "vmem_capacity_bytes"))
    except Exception:
        return None


def rationale_loss(preds, targets, pdf0, mask, a=None, b=None, *,
                   lambda_sparsity=LAMBDA_SPARSITY, lambda_lasso=LAMBDA_LASSO,
                   block_b=None, num_splits=None):
    """Pallas implementation of RationaleLoss.forward (z_dists given as pdf0 [+ a, b]).

    Contract: `mask` must be exactly {0, 1} (matching the torch code's mask.byte()).
    """
    B, C = preds.shape
    T = mask.shape[1]
    include_ab = (a is not None) and (b is not None)

    # Pad seq dim to a lane multiple: full-vreg loads/reductions, roll needs no wrap
    # mask when padding exists (padded columns are zero in mask / pdf0 / a / b).
    t_pad = ((T + 127) // 128) * 128
    seq_arrays = [pdf0, mask] + ([a, b] if include_ab else [])

    # ---- generation-aware VMEM budget (v5e/v6e: 128 MiB; v7x: 64 MiB per TC) ----
    vmem_cap = _tpu_vmem_capacity()
    big_vmem = vmem_cap is not None and vmem_cap >= 96 * (2 ** 20)
    likely_two_cores = vmem_cap is not None and not big_vmem          # v7x heuristic
    vmem_limit = (96 if big_vmem else 48) * (2 ** 20)

    # ---- batch tile: dtype-aware and temporaries-aware ----
    if block_b is not None:
        tb = max(1, int(block_b))
    else:
        # Per grid step: double-buffered native-dtype input windows plus ~6 block-sized
        # f32 body temporaries (upcasts, pdf0/pdf_nz, rolled copies, lasso products).
        in_bytes_per_row = sum(jnp.dtype(x.dtype).itemsize for x in seq_arrays) * t_pad
        per_row = 2 * in_bytes_per_row + 6 * 4 * t_pad + 2 * 4 * C + 16
        tb = int(0.55 * vmem_limit) // per_row
    if tb >= B:
        tb = B                         # single block spanning the full batch
    else:
        tb = max(8, (tb // 8) * 8)     # sublane-aligned batch tiles

    n_blocks = pl.cdiv(B, tb)
    if num_splits is None:
        num_splits = 2 if (likely_two_cores and n_blocks >= 2) else 1
    num_splits = max(1, min(num_splits, n_blocks))
    steps = pl.cdiv(n_blocks, num_splits)
    b_pad = num_splits * steps * tb

    def pad2d(x, cols):
        pr = b_pad - x.shape[0]
        pc = cols - x.shape[1]
        if pr == 0 and pc == 0:
            return x
        return jnp.pad(x, ((0, pr), (0, pc)))

    targets2d = pad2d(targets.reshape(B, 1).astype(jnp.int32), 1)
    # Inputs keep their native dtype (e.g. bf16): no wrapper-side f32 materialization.
    inputs = [pad2d(preds, C), targets2d, pad2d(pdf0, t_pad), pad2d(mask, t_pad)]
    if include_ab:
        inputs += [pad2d(a, t_pad), pad2d(b, t_pad)]

    def bmap(c_idx, j_idx):
        return (c_idx * steps + j_idx, 0)

    in_specs = [pl.BlockSpec((tb, C), bmap),
                pl.BlockSpec((tb, 1), bmap),
                pl.BlockSpec((tb, t_pad), bmap),
                pl.BlockSpec((tb, t_pad), bmap)]
    if include_ab:
        in_specs += [pl.BlockSpec((tb, t_pad), bmap),
                     pl.BlockSpec((tb, t_pad), bmap)]

    n_acc = 5 if include_ab else 3
    out = pl.pallas_call(
        _make_kernel(B, tb, T, t_pad, include_ab),
        out_shape=jax.ShapeDtypeStruct((num_splits * 8, 128), jnp.float32),
        grid=(num_splits, steps),
        in_specs=in_specs,
        out_specs=pl.BlockSpec((8, 128), lambda c_idx, j_idx: (c_idx, 0)),
        scratch_shapes=[pltpu.VMEM((1, 1), jnp.float32)] * n_acc,
        compiler_params=pltpu.CompilerParams(
            dimension_semantics=("parallel", "arbitrary"),
            vmem_limit_bytes=vmem_limit),
    )(*inputs)

    # Combine the per-split partial sums and finish with a handful of scalar ops.
    sums = jnp.sum(out.reshape(num_splits, 8, 128)[:, 0, :], axis=0)   # [128]
    ce = sums[LANE_CE] / B
    l0 = sums[LANE_L0] / B
    lasso = sums[LANE_LASSO] / B
    loss = ce + lambda_sparsity * l0 + lambda_lasso * lasso

    optional = {"ce": ce, "cost0_l0": l0, "cost1_lasso": lasso, "no_ce": loss - ce}
    if include_ab:
        optional["a"] = sums[LANE_A] / (B * T)
        optional["b"] = sums[LANE_B] / (B * T)
    return loss, optional


def _reference(preds, targets, pdf0_raw, mask, a=None, b=None):
    """Pure-JAX reference mirroring the torch forward."""
    preds = preds.astype(jnp.float32)
    pdf0_raw = pdf0_raw.astype(jnp.float32)
    mask = mask.astype(jnp.float32)

    lse = jax.nn.logsumexp(preds, axis=1)
    tgt_logit = jnp.take_along_axis(preds, targets[:, None], axis=1)[:, 0]
    ce = jnp.mean(lse - tgt_logit)

    mask_b = mask > 0.5
    lengths = jnp.sum(mask, axis=1)
    pdf0 = jnp.where(mask_b, pdf0_raw, 0.0)
    pdf_nz = jnp.where(mask_b, 1.0 - pdf0_raw, 0.0)
    l0 = jnp.mean(jnp.sum(pdf_nz, axis=1) / (lengths + EPS))

    lasso_terms = (pdf0[:, :-1] * pdf_nz[:, 1:] + pdf_nz[:, :-1] * pdf0[:, 1:]) * mask[:, :-1]
    lasso = jnp.mean(jnp.sum(lasso_terms, axis=1) / (lengths + EPS))

    loss = ce + LAMBDA_SPARSITY * l0 + LAMBDA_LASSO * lasso
    ref = {"loss": loss, "ce": ce, "l0": l0, "lasso": lasso}
    if a is not None:
        ref["a"] = jnp.mean(a.astype(jnp.float32))
        ref["b"] = jnp.mean(b.astype(jnp.float32))
    return ref


if __name__ == "__main__":
    # ---- case 1: small f32 batch with a/b diagnostics (T padded 16 -> 128) ----
    B, C, T = 4, 4, 16
    key = jax.random.PRNGKey(0)
    k1, k2, k3, k4, k5 = jax.random.split(key, 5)

    preds = jax.random.normal(k1, (B, C), dtype=jnp.float32)
    targets = jax.random.randint(k2, (B,), 0, C, dtype=jnp.int32)
    pdf0 = jax.nn.sigmoid(jax.random.normal(k3, (B, T), dtype=jnp.float32))
    seq_lens = jnp.array([16, 12, 10, 7], dtype=jnp.int32)
    mask = (jnp.arange(T)[None, :] < seq_lens[:, None]).astype(jnp.float32)
    a = jax.nn.softplus(jax.random.normal(k4, (B, T), dtype=jnp.float32)) + 0.1
    b = jax.nn.softplus(jax.random.normal(k5, (B, T), dtype=jnp.float32)) + 0.1

    loss, optional = rationale_loss(preds, targets, pdf0, mask, a, b)
    jax.block_until_ready(loss)

    ref = _reference(preds, targets, pdf0, mask, a, b)
    assert jnp.allclose(loss, ref["loss"], rtol=1e-5, atol=1e-5), (loss, ref["loss"])
    assert jnp.allclose(optional["ce"], ref["ce"], rtol=1e-5, atol=1e-5)
    assert jnp.allclose(optional["cost0_l0"], ref["l0"], rtol=1e-5, atol=1e-5)
    assert jnp.allclose(optional["cost1_lasso"], ref["lasso"], rtol=1e-5, atol=1e-5)
    assert jnp.allclose(optional["a"], ref["a"], rtol=1e-5, atol=1e-5)
    assert jnp.allclose(optional["b"], ref["b"], rtol=1e-5, atol=1e-5)
    assert jnp.allclose(optional["no_ce"], loss - optional["ce"], rtol=1e-5, atol=1e-5)

    # ---- case 2: bf16 seq inputs, T exactly 128 (wrap-pair path), batch tiling +
    #      row padding + explicit 2-way split, no a/b ----
    B2, C2, T2 = 20, 3, 128
    j1, j2, j3, j4 = jax.random.split(jax.random.PRNGKey(1), 4)
    preds2 = jax.random.normal(j1, (B2, C2), dtype=jnp.float32)
    targets2 = jax.random.randint(j2, (B2,), 0, C2, dtype=jnp.int32)
    pdf02 = jax.nn.sigmoid(jax.random.normal(j3, (B2, T2), dtype=jnp.float32)).astype(jnp.bfloat16)
    lens2 = jax.random.randint(j4, (B2,), 1, T2 + 1, dtype=jnp.int32)
    lens2 = lens2.at[0].set(T2)   # ensure a full-length row so the wrap term matters
    mask2 = (jnp.arange(T2)[None, :] < lens2[:, None]).astype(jnp.bfloat16)

    loss2, opt2 = rationale_loss(preds2, targets2, pdf02, mask2, block_b=8, num_splits=2)
    jax.block_until_ready(loss2)

    ref2 = _reference(preds2, targets2, pdf02, mask2)
    assert jnp.allclose(loss2, ref2["loss"], rtol=1e-5, atol=1e-5), (loss2, ref2["loss"])
    assert jnp.allclose(opt2["ce"], ref2["ce"], rtol=1e-5, atol=1e-5)
    assert jnp.allclose(opt2["cost0_l0"], ref2["l0"], rtol=1e-5, atol=1e-5)
    assert jnp.allclose(opt2["cost1_lasso"], ref2["lasso"], rtol=1e-5, atol=1e-5)
    assert "a" not in opt2 and "b" not in opt2

    print("KERNEL_OK")
</pallas_src>

<mosaic_0001>
module attributes {stable_mosaic.version = 11 : i64} {
  func.func @kernel(%arg0: i32, %arg1: i32, %arg2: memref<4x4xf32, #tpu.memory_space<vmem>>, %arg3: memref<4x1xi32, #tpu.memory_space<vmem>>, %arg4: memref<4x128xf32, #tpu.memory_space<vmem>>, %arg5: memref<4x128xf32, #tpu.memory_space<vmem>>, %arg6: memref<4x128xf32, #tpu.memory_space<vmem>>, %arg7: memref<4x128xf32, #tpu.memory_space<vmem>>, %arg8: memref<8x128xf32, #tpu.memory_space<vmem>>, %arg9: memref<1x1xf32, #tpu.memory_space<vmem>>, %arg10: memref<1x1xf32, #tpu.memory_space<vmem>>, %arg11: memref<1x1xf32, #tpu.memory_space<vmem>>, %arg12: memref<1x1xf32, #tpu.memory_space<vmem>>, %arg13: memref<1x1xf32, #tpu.memory_space<vmem>>) attributes {dimension_semantics = [#tpu.dimension_semantics<parallel>, #tpu.dimension_semantics<arbitrary>], iteration_bounds = array<i64: 1, 1>, scalar_prefetch = 0 : i64, scratch_operands = 5 : i64, tpu.core_type = #tpu.core_type<tc>, window_params = [{transform_indices = @transform_0, window_bounds = array<i64: 4, 4>}, {transform_indices = @transform_1, window_bounds = array<i64: 4, 1>}, {transform_indices = @transform_2, window_bounds = array<i64: 4, 128>}, {transform_indices = @transform_3, window_bounds = array<i64: 4, 128>}, {transform_indices = @transform_4, window_bounds = array<i64: 4, 128>}, {transform_indices = @transform_5, window_bounds = array<i64: 4, 128>}, {transform_indices = @transform_6, window_bounds = array<i64: 8, 128>}]} {
    %c0_i32 = arith.constant 0 : i32
    %0 = arith.cmpi eq, %arg1, %c0_i32 : i32
    %1 = arith.extui %0 : i1 to i32
    %c0_i32_0 = arith.constant 0 : i32
    %2 = arith.cmpi ne, %1, %c0_i32_0 : i32
    scf.if %2 {
      %cst_50 = arith.constant 0.000000e+00 : f32
      %90 = vector.broadcast %cst_50 : f32 to vector<1x1xf32>
      %c0_51 = arith.constant 0 : index
      %c0_52 = arith.constant 0 : index
      %91 = vector.load %arg9[%c0_51, %c0_52] : memref<1x1xf32, #tpu.memory_space<vmem>>, vector<1x1xf32>
      tpu.vector_store %arg9[%c0_51, %c0_52], %90 {strides = array<i32>} : memref<1x1xf32, #tpu.memory_space<vmem>>, vector<1x1xf32>,
      %cst_53 = arith.constant 0.000000e+00 : f32
      %92 = vector.broadcast %cst_53 : f32 to vector<1x1xf32>
      %c0_54 = arith.constant 0 : index
      %c0_55 = arith.constant 0 : index
      %93 = vector.load %arg10[%c0_54, %c0_55] : memref<1x1xf32, #tpu.memory_space<vmem>>, vector<1x1xf32>
      tpu.vector_store %arg10[%c0_54, %c0_55], %92 {strides = array<i32>} : memref<1x1xf32, #tpu.memory_space<vmem>>, vector<1x1xf32>,
      %cst_56 = arith.constant 0.000000e+00 : f32
      %94 = vector.broadcast %cst_56 : f32 to vector<1x1xf32>
      %c0_57 = arith.constant 0 : index
      %c0_58 = arith.constant 0 : index
      %95 = vector.load %arg11[%c0_57, %c0_58] : memref<1x1xf32, #tpu.memory_space<vmem>>, vector<1x1xf32>
      tpu.vector_store %arg11[%c0_57, %c0_58], %94 {strides = array<i32>} : memref<1x1xf32, #tpu.memory_space<vmem>>, vector<1x1xf32>,
      %cst_59 = arith.constant 0.000000e+00 : f32
      %96 = vector.broadcast %cst_59 : f32 to vector<1x1xf32>
      %c0_60 = arith.constant 0 : index
      %c0_61 = arith.constant 0 : index
      %97 = vector.load %arg12[%c0_60, %c0_61] : memref<1x1xf32, #tpu.memory_space<vmem>>, vector<1x1xf32>
      tpu.vector_store %arg12[%c0_60, %c0_61], %96 {strides = array<i32>} : memref<1x1xf32, #tpu.memory_space<vmem>>, vector<1x1xf32>,
      %cst_62 = arith.constant 0.000000e+00 : f32
      %98 = vector.broadcast %cst_62 : f32 to vector<1x1xf32>
      %c0_63 = arith.constant 0 : index
      %c0_64 = arith.constant 0 : index
      %99 = vector.load %arg13[%c0_63, %c0_64] : memref<1x1xf32, #tpu.memory_space<vmem>>, vector<1x1xf32>
      tpu.vector_store %arg13[%c0_63, %c0_64], %98 {strides = array<i32>} : memref<1x1xf32, #tpu.memory_space<vmem>>, vector<1x1xf32>,
    } else {
    }
    %c0 = arith.constant 0 : index
    %c0_1 = arith.constant 0 : index
    %3 = vector.load %arg2[%c0, %c0_1] : memref<4x4xf32, #tpu.memory_space<vmem>>, vector<4x4xf32>
    %c0_2 = arith.constant 0 : index
    %c0_3 = arith.constant 0 : index
    %4 = vector.load %arg3[%c0_2, %c0_3] : memref<4x1xi32, #tpu.memory_space<vmem>>, vector<4x1xi32>
    %c0_4 = arith.constant 0 : index
    %c0_5 = arith.constant 0 : index
    %5 = vector.load %arg4[%c0_4, %c0_5] : memref<4x128xf32, #tpu.memory_space<vmem>>, vector<4x128xf32>
    %c0_6 = arith.constant 0 : index
    %c0_7 = arith.constant 0 : index
    %6 = vector.load %arg5[%c0_6, %c0_7] : memref<4x128xf32, #tpu.memory_space<vmem>>, vector<4x128xf32>
    %7 = tpu.iota {dimensions = array<i32: 0>} : vector<4x1xi32>
    %c1_i32 = arith.constant 1 : i32
    %8 = arith.muli %arg0, %c1_i32 : i32
    %9 = arith.addi %8, %arg1 : i32
    %c4_i32 = arith.constant 4 : i32
    %10 = arith.muli %9, %c4_i32 : i32
    %11 = vector.broadcast %10 : i32 to vector<4x1xi32>
    %12 = arith.addi %11, %7 : vector<4x1xi32>
    %c4_i32_8 = arith.constant 4 : i32
    %13 = vector.broadcast %c4_i32_8 : i32 to vector<4x1xi32>
    %14 = arith.cmpi slt, %12, %13 : vector<4x1xi32>
    %15 = arith.extui %14 : vector<4x1xi1> to vector<4x1xi32>
    %16 = arith.sitofp %15 : vector<4x1xi32> to vector<4x1xf32>
    %cst = arith.constant dense<0xFF800000> : vector<4xf32>
    %17 = vector.multi_reduction <maximumf>, %3, %cst [1] : vector<4x4xf32> to vector<4xf32>
    %18 = vector.shape_cast %17 : vector<4xf32> to vector<4x1xf32>
    %19 = vector.broadcast %18 : vector<4x1xf32> to vector<4x4xf32>
    %20 = arith.subf %3, %19 : vector<4x4xf32>
    %21 = math.exp %20 : vector<4x4xf32>
    %cst_9 = arith.constant dense<0.000000e+00> : vector<4xf32>
    %22 = vector.multi_reduction <add>, %21, %cst_9 [1] : vector<4x4xf32> to vector<4xf32>
    %23 = vector.shape_cast %22 : vector<4xf32> to vector<4x1xf32>
    %24 = math.log %23 : vector<4x1xf32>
    %25 = arith.addf %24, %18 : vector<4x1xf32>
    %26 = tpu.iota {dimensions = array<i32: 1>} : vector<4x4xi32>
    %27 = vector.broadcast %4 : vector<4x1xi32> to vector<4x4xi32>
    %28 = arith.cmpi eq, %26, %27 : vector<4x4xi32>
    %cst_10 = arith.constant 0.000000e+00 : f32
    %29 = vector.broadcast %cst_10 : f32 to vector<4x4xf32>
    %30 = arith.select %28, %3, %29 : vector<4x4xi1>, vector<4x4xf32>
    %cst_11 = arith.constant dense<0.000000e+00> : vector<4xf32>
    %31 = vector.multi_reduction <add>, %30, %cst_11 [1] : vector<4x4xf32> to vector<4xf32>
    %32 = vector.shape_cast %31 : vector<4xf32> to vector<4x1xf32>
    %c0_12 = arith.constant 0 : index
    %c0_13 = arith.constant 0 : index
    %33 = vector.load %arg9[%c0_12, %c0_13] : memref<1x1xf32, #tpu.memory_space<vmem>>, vector<1x1xf32>
    %34 = arith.subf %25, %32 : vector<4x1xf32>
    %35 = arith.mulf %34, %16 : vector<4x1xf32>
    %cst_14 = arith.constant dense<0.000000e+00> : vector<1xf32>
    %36 = vector.multi_reduction <add>, %35, %cst_14 [0] : vector<4x1xf32> to vector<1xf32>
    %37 = vector.shape_cast %36 : vector<1xf32> to vector<1x1xf32>
    %38 = arith.addf %33, %37 : vector<1x1xf32>
    %c0_15 = arith.constant 0 : index
    %c0_16 = arith.constant 0 : index
    %39 = vector.load %arg9[%c0_15, %c0_16] : memref<1x1xf32, #tpu.memory_space<vmem>>, vector<1x1xf32>
    tpu.vector_store %arg9[%c0_15, %c0_16], %38 {strides = array<i32>} : memref<1x1xf32, #tpu.memory_space<vmem>>, vector<1x1xf32>,
    %cst_17 = arith.constant dense<0.000000e+00> : vector<4xf32>
    %40 = vector.multi_reduction <add>, %6, %cst_17 [1] : vector<4x128xf32> to vector<4xf32>
    %41 = vector.shape_cast %40 : vector<4xf32> to vector<4x1xf32>
    %cst_18 = arith.constant 9.99999971E-10 : f32
    %42 = vector.broadcast %cst_18 : f32 to vector<4x1xf32>
    %43 = arith.addf %41, %42 : vector<4x1xf32>
    %44 = tpu.reciprocal %43 : vector<4x1xf32> -> vector<4x1xf32>
    %45 = arith.mulf %44, %16 : vector<4x1xf32>
    %46 = arith.mulf %5, %6 : vector<4x128xf32>
    %47 = arith.subf %6, %46 : vector<4x128xf32>
    %c0_19 = arith.constant 0 : index
    %c0_20 = arith.constant 0 : index
    %48 = vector.load %arg10[%c0_19, %c0_20] : memref<1x1xf32, #tpu.memory_space<vmem>>, vector<1x1xf32>
    %cst_21 = arith.constant dense<0.000000e+00> : vector<4xf32>
    %49 = vector.multi_reduction <add>, %47, %cst_21 [1] : vector<4x128xf32> to vector<4xf32>
    %50 = vector.shape_cast %49 : vector<4xf32> to vector<4x1xf32>
    %51 = arith.mulf %50, %45 : vector<4x1xf32>
    %cst_22 = arith.constant dense<0.000000e+00> : vector<1xf32>
    %52 = vector.multi_reduction <add>, %51, %cst_22 [0] : vector<4x1xf32> to vector<1xf32>
    %53 = vector.shape_cast %52 : vector<1xf32> to vector<1x1xf32>
    %54 = arith.addf %48, %53 : vector<1x1xf32>
    %c0_23 = arith.constant 0 : index
    %c0_24 = arith.constant 0 : index
    %55 = vector.load %arg10[%c0_23, %c0_24] : memref<1x1xf32, #tpu.memory_space<vmem>>, vector<1x1xf32>
    tpu.vector_store %arg10[%c0_23, %c0_24], %54 {strides = array<i32>} : memref<1x1xf32, #tpu.memory_space<vmem>>, vector<1x1xf32>,
    %c127_i32 = arith.constant 127 : i32
    %56 = tpu.dynamic_rotate %47 by %c127_i32 dim 1 : vector<4x128xf32>, i32 -> vector<4x128xf32>
    %c127_i32_25 = arith.constant 127 : i32
    %57 = tpu.dynamic_rotate %46 by %c127_i32_25 dim 1 : vector<4x128xf32>, i32 -> vector<4x128xf32>
    %58 = arith.mulf %46, %56 : vector<4x128xf32>
    %59 = arith.mulf %47, %57 : vector<4x128xf32>
    %60 = arith.addf %58, %59 : vector<4x128xf32>
    %cst_26 = arith.constant dense<0.000000e+00> : vector<4xf32>
    %61 = vector.multi_reduction <add>, %60, %cst_26 [1] : vector<4x128xf32> to vector<4xf32>
    %62 = vector.shape_cast %61 : vector<4xf32> to vector<4x1xf32>
    %c0_27 = arith.constant 0 : index
    %c0_28 = arith.constant 0 : index
    %63 = vector.load %arg11[%c0_27, %c0_28] : memref<1x1xf32, #tpu.memory_space<vmem>>, vector<1x1xf32>
    %64 = arith.mulf %62, %45 : vector<4x1xf32>
    %cst_29 = arith.constant dense<0.000000e+00> : vector<1xf32>
    %65 = vector.multi_reduction <add>, %64, %cst_29 [0] : vector<4x1xf32> to vector<1xf32>
    %66 = vector.shape_cast %65 : vector<1xf32> to vector<1x1xf32>
    %67 = arith.addf %63, %66 : vector<1x1xf32>
    %c0_30 = arith.constant 0 : index
    %c0_31 = arith.constant 0 : index
    %68 = vector.load %arg11[%c0_30, %c0_31] : memref<1x1xf32, #tpu.memory_space<vmem>>, vector<1x1xf32>
    tpu.vector_store %arg11[%c0_30, %c0_31], %67 {strides = array<i32>} : memref<1x1xf32, #tpu.memory_space<vmem>>, vector<1x1xf32>,
    %c0_32 = arith.constant 0 : index
    %c0_33 = arith.constant 0 : index
    %69 = vector.load %arg6[%c0_32, %c0_33] : memref<4x128xf32, #tpu.memory_space<vmem>>, vector<4x128xf32>
    %c0_34 = arith.constant 0 : index
    %c0_35 = arith.constant 0 : index
    %70 = vector.load %arg7[%c0_34, %c0_35] : memref<4x128xf32, #tpu.memory_space<vmem>>, vector<4x128xf32>
    %c0_36 = arith.constant 0 : index
    %c0_37 = arith.constant 0 : index
    %71 = vector.load %arg12[%c0_36, %c0_37] : memref<1x1xf32, #tpu.memory_space<vmem>>, vector<1x1xf32>
    %cst_38 = arith.constant dense<0.000000e+00> : vector<4xf32>
    %72 = vector.multi_reduction <add>, %69, %cst_38 [1] : vector<4x128xf32> to vector<4xf32>
    %73 = vector.shape_cast %72 : vector<4xf32> to vector<4x1xf32>
    %74 = arith.mulf %73, %16 : vector<4x1xf32>
    %cst_39 = arith.constant dense<0.000000e+00> : vector<1xf32>
    %75 = vector.multi_reduction <add>, %74, %cst_39 [0] : vector<4x1xf32> to vector<1xf32>
    %76 = vector.shape_cast %75 : vector<1xf32> to vector<1x1xf32>
    %77 = arith.addf %71, %76 : vector<1x1xf32>
    %c0_40 = arith.constant 0 : index
    %c0_41 = arith.constant 0 : index
    %78 = vector.load %arg12[%c0_40, %c0_41] : memref<1x1xf32, #tpu.memory_space<vmem>>, vector<1x1xf32>
    tpu.vector_store %arg12[%c0_40, %c0_41], %77 {strides = array<i32>} : memref<1x1xf32, #tpu.memory_space<vmem>>, vector<1x1xf32>,
    %c0_42 = arith.constant 0 : index
    %c0_43 = arith.constant 0 : index
    %79 = vector.load %arg13[%c0_42, %c0_43] : memref<1x1xf32, #tpu.memory_space<vmem>>, vector<1x1xf32>
    %cst_44 = arith.constant dense<0.000000e+00> : vector<4xf32>
    %80 = vector.multi_reduction <add>, %70, %cst_44 [1] : vector<4x128xf32> to vector<4xf32>
    %81 = vector.shape_cast %80 : vector<4xf32> to vector<4x1xf32>
    %82 = arith.mulf %81, %16 : vector<4x1xf32>
    %cst_45 = arith.constant dense<0.000000e+00> : vector<1xf32>
    %83 = vector.multi_reduction <add>, %82, %cst_45 [0] : vector<4x1xf32> to vector<1xf32>
    %84 = vector.shape_cast %83 : vector<1xf32> to vector<1x1xf32>
    %85 = arith.addf %79, %84 : vector<1x1xf32>
    %c0_46 = arith.constant 0 : index
    %c0_47 = arith.constant 0 : index
    %86 = vector.load %arg13[%c0_46, %c0_47] : memref<1x1xf32, #tpu.memory_space<vmem>>, vector<1x1xf32>
    tpu.vector_store %arg13[%c0_46, %c0_47], %85 {strides = array<i32>} : memref<1x1xf32, #tpu.memory_space<vmem>>, vector<1x1xf32>,
    %c0_i32_48 = arith.constant 0 : i32
    %87 = arith.cmpi eq, %arg1, %c0_i32_48 : i32
    %88 = arith.extui %87 : i1 to i32
    %c0_i32_49 = arith.constant 0 : i32
    %89 = arith.cmpi ne, %88, %c0_i32_49 : i32
    scf.if %89 {
      %90 = tpu.iota {dimensions = array<i32: 1>} : vector<8x128xi32>
      %91 = tpu.iota {dimensions = array<i32: 0>} : vector<8x128xi32>
      %c0_i32_50 = arith.constant 0 : i32
      %92 = vector.broadcast %c0_i32_50 : i32 to vector<8x128xi32>
      %93 = arith.cmpi eq, %91, %92 : vector<8x128xi32>
      %c0_i32_51 = arith.constant 0 : i32
      %94 = vector.broadcast %c0_i32_51 : i32 to vector<8x128xi32>
      %95 = arith.cmpi eq, %90, %94 : vector<8x128xi32>
      %96 = arith.andi %93, %95 : vector<8x128xi1>
      %c0_52 = arith.constant 0 : index
      %c0_53 = arith.constant 0 : index
      %97 = vector.load %arg9[%c0_52, %c0_53] : memref<1x1xf32, #tpu.memory_space<vmem>>, vector<1x1xf32>
      %cst_54 = arith.constant 0.000000e+00 : f32
      %98 = vector.shape_cast %97 : vector<1x1xf32> to vector<1x1xf32>
      %99 = vector.broadcast %98 : vector<1x1xf32> to vector<8x128xf32>
      %100 = vector.broadcast %cst_54 : f32 to vector<8x128xf32>
      %101 = arith.select %96, %99, %100 : vector<8x128xi1>, vector<8x128xf32>
      %c1_i32_55 = arith.constant 1 : i32
      %102 = vector.broadcast %c1_i32_55 : i32 to vector<8x128xi32>
      %103 = arith.cmpi eq, %90, %102 : vector<8x128xi32>
      %104 = arith.andi %93, %103 : vector<8x128xi1>
      %c0_56 = arith.constant 0 : index
      %c0_57 = arith.constant 0 : index
      %105 = vector.load %arg10[%c0_56, %c0_57] : memref<1x1xf32, #tpu.memory_space<vmem>>, vector<1x1xf32>
      %cst_58 = arith.constant 0.000000e+00 : f32
      %106 = vector.shape_cast %105 : vector<1x1xf32> to vector<1x1xf32>
      %107 = vector.broadcast %106 : vector<1x1xf32> to vector<8x128xf32>
      %108 = vector.broadcast %cst_58 : f32 to vector<8x128xf32>
      %109 = arith.select %104, %107, %108 : vector<8x128xi1>, vector<8x128xf32>
      %110 = arith.addf %101, %109 : vector<8x128xf32>
      %c2_i32 = arith.constant 2 : i32
      %111 = vector.broadcast %c2_i32 : i32 to vector<8x128xi32>
      %112 = arith.cmpi eq, %90, %111 : vector<8x128xi32>
      %113 = arith.andi %93, %112 : vector<8x128xi1>
      %c0_59 = arith.constant 0 : index
      %c0_60 = arith.constant 0 : index
      %114 = vector.load %arg11[%c0_59, %c0_60] : memref<1x1xf32, #tpu.memory_space<vmem>>, vector<1x1xf32>
      %cst_61 = arith.constant 0.000000e+00 : f32
      %115 = vector.shape_cast %114 : vector<1x1xf32> to vector<1x1xf32>
      %116 = vector.broadcast %115 : vector<1x1xf32> to vector<8x128xf32>
      %117 = vector.broadcast %cst_61 : f32 to vector<8x128xf32>
      %118 = arith.select %113, %116, %117 : vector<8x128xi1>, vector<8x128xf32>
      %119 = arith.addf %110, %118 : vector<8x128xf32>
      %c3_i32 = arith.constant 3 : i32
      %120 = vector.broadcast %c3_i32 : i32 to vector<8x128xi32>
      %121 = arith.cmpi eq, %90, %120 : vector<8x128xi32>
      %122 = arith.andi %93, %121 : vector<8x128xi1>
      %c0_62 = arith.constant 0 : index
      %c0_63 = arith.constant 0 : index
      %123 = vector.load %arg12[%c0_62, %c0_63] : memref<1x1xf32, #tpu.memory_space<vmem>>, vector<1x1xf32>
      %cst_64 = arith.constant 0.000000e+00 : f32
      %124 = vector.shape_cast %123 : vector<1x1xf32> to vector<1x1xf32>
      %125 = vector.broadcast %124 : vector<1x1xf32> to vector<8x128xf32>
      %126 = vector.broadcast %cst_64 : f32 to vector<8x128xf32>
      %127 = arith.select %122, %125, %126 : vector<8x128xi1>, vector<8x128xf32>
      %128 = arith.addf %119, %127 : vector<8x128xf32>
      %c4_i32_65 = arith.constant 4 : i32
      %129 = vector.broadcast %c4_i32_65 : i32 to vector<8x128xi32>
      %130 = arith.cmpi eq, %90, %129 : vector<8x128xi32>
      %131 = arith.andi %93, %130 : vector<8x128xi1>
      %c0_66 = arith.constant 0 : index
      %c0_67 = arith.constant 0 : index
      %132 = vector.load %arg13[%c0_66, %c0_67] : memref<1x1xf32, #tpu.memory_space<vmem>>, vector<1x1xf32>
      %cst_68 = arith.constant 0.000000e+00 : f32
      %133 = vector.shape_cast %132 : vector<1x1xf32> to vector<1x1xf32>
      %134 = vector.broadcast %133 : vector<1x1xf32> to vector<8x128xf32>
      %135 = vector.broadcast %cst_68 : f32 to vector<8x128xf32>
      %136 = arith.select %131, %134, %135 : vector<8x128xi1>, vector<8x128xf32>
      %137 = arith.addf %128, %136 : vector<8x128xf32>
      %c0_69 = arith.constant 0 : index
      %c0_70 = arith.constant 0 : index
      %138 = vector.load %arg8[%c0_69, %c0_70] : memref<8x128xf32, #tpu.memory_space<vmem>>, vector<8x128xf32>
      tpu.vector_store %arg8[%c0_69, %c0_70], %137 {strides = array<i32>} : memref<8x128xf32, #tpu.memory_space<vmem>>, vector<8x128xf32>,
    } else {
    }
    return
  }
  func.func @transform_0(%arg0: i32, %arg1: i32) -> (i32, i32) {
    %c1_i32 = arith.constant 1 : i32
    %0 = arith.muli %arg0, %c1_i32 : i32
    %1 = arith.addi %0, %arg1 : i32
    %c0_i32 = arith.constant 0 : i32
    %c0_i32_0 = arith.constant 0 : i32
    return %1, %c0_i32 : i32, i32
  }
  func.func @transform_1(%arg0: i32, %arg1: i32) -> (i32, i32) {
    %c1_i32 = arith.constant 1 : i32
    %0 = arith.muli %arg0, %c1_i32 : i32
    %1 = arith.addi %0, %arg1 : i32
    %c0_i32 = arith.constant 0 : i32
    %c0_i32_0 = arith.constant 0 : i32
    return %1, %c0_i32 : i32, i32
  }
  func.func @transform_2(%arg0: i32, %arg1: i32) -> (i32, i32) {
    %c1_i32 = arith.constant 1 : i32
    %0 = arith.muli %arg0, %c1_i32 : i32
    %1 = arith.addi %0, %arg1 : i32
    %c0_i32 = arith.constant 0 : i32
    %c0_i32_0 = arith.constant 0 : i32
    return %1, %c0_i32 : i32, i32
  }
  func.func @transform_3(%arg0: i32, %arg1: i32) -> (i32, i32) {
    %c1_i32 = arith.constant 1 : i32
    %0 = arith.muli %arg0, %c1_i32 : i32
    %1 = arith.addi %0, %arg1 : i32
    %c0_i32 = arith.constant 0 : i32
    %c0_i32_0 = arith.constant 0 : i32
    return %1, %c0_i32 : i32, i32
  }
  func.func @transform_4(%arg0: i32, %arg1: i32) -> (i32, i32) {
    %c1_i32 = arith.constant 1 : i32
    %0 = arith.muli %arg0, %c1_i32 : i32
    %1 = arith.addi %0, %arg1 : i32
    %c0_i32 = arith.constant 0 : i32
    %c0_i32_0 = arith.constant 0 : i32
    return %1, %c0_i32 : i32, i32
  }
  func.func @transform_5(%arg0: i32, %arg1: i32) -> (i32, i32) {
    %c1_i32 = arith.constant 1 : i32
    %0 = arith.muli %arg0, %c1_i32 : i32
    %1 = arith.addi %0, %arg1 : i32
    %c0_i32 = arith.constant 0 : i32
    %c0_i32_0 = arith.constant 0 : i32
    return %1, %c0_i32 : i32, i32
  }
  func.func @transform_6(%arg0: i32, %arg1: i32) -> (i32, i32) {
    %c0_i32 = arith.constant 0 : i32
    %c0_i32_0 = arith.constant 0 : i32
    return %arg0, %c0_i32 : i32, i32
  }
}

</mosaic_0001>

<bundles_post_ra>
// kernel: tpu_custom_call.1
= control target key start
LH: loop header
LB: loop body
LE: loop exit
PB: predicated region body
PF: predicated region fallthrough
CT: control target
= control target key end

     0   :  { %11 = vsyncpa [#allocation8], 0  ;;  %s605_s0 = inlined_call_operand.vmem [shape: f32[4,4], index: 0, kind: input, shape index: {}]   ;;  %s606_s1 = inlined_call_operand.vmem [shape: s32[4,1], index: 1, kind: input, shape index: {}]   ;;  %s607_s2 = inlined_call_operand.hbm [shape: f32[4,128], index: 2, kind: input, shape index: {}]   ;;  %s608_s3 = inlined_call_operand.hbm [shape: f32[4,128], index: 3, kind: input, shape index: {}]   ;;  %s609_s4 = inlined_call_operand.vmem [shape: f32[4,128], index: 4, kind: input, shape index: {}]   ;;  %s610_s5 = inlined_call_operand.hbm [shape: f32[4,128], index: 5, kind: input, shape index: {}]   ;;  %s611_s6 = inlined_call_operand.hbm [shape: f32[8,128], index: 6, kind: output, shape index: {}]  }
   0x1   :  { %12 = vsyncpa [#allocation11], 0  ;;  %s52_s23 = sshll.u32 %s608_s3, 4  ;;  %s53_s23 = int_to_ptr.hbm [resolvable:$true] %s52_s23 }
   0x2   :  { %13 = vsyncpa [#allocation9], 0  ;;  %s493_s24 = smov [#allocation10]   ;;  %s38_s28 = sshll.u32 %s607_s2, 4  ;;  %s39_s28 = int_to_ptr.hbm [resolvable:$true] %s38_s28 }
   0x3   :  { %s54_s25 = sshll.u32 %s493_s24, 4  ;;  %s494_s29 = smov [#allocation7]   ;;  %s55_s25 = int_to_ptr.vmem [resolvable:$true] %s54_s25 }
   0x4   :  { %57 = dma.hbm_to_vmem [thread:$0]  %s53_s23, 64, %s55_s25, [#allocation11]  }
   0x5   :  { %s40_s30 = sshll.u32 %s494_s29, 4  ;;  %s74_s9 = sshll.u32 %s610_s5, 4  ;;  %s41_s30 = int_to_ptr.vmem [resolvable:$true] %s40_s30  ;;  %s75_s9 = int_to_ptr.hbm [resolvable:$true] %s74_s9 }
   0x6   :  { %43 = dma.hbm_to_vmem [thread:$0]  %s39_s28, 64, %s41_s30, [#allocation8]  }
   0x7   :  { %s495_s3 = smov [#allocation12]  }
   0x8   :  { %s76_s10 = sshll.u32 %s495_s3, 4  ;;  %s77_s10 = int_to_ptr.vmem [resolvable:$true] %s76_s10 }
   0x9   :  { %79 = dma.hbm_to_vmem [thread:$0]  %s75_s9, 64, %s77_s10, [#allocation11]  }
   0xa   :  { %487 = dma.done.wait [#allocation8], 64  }
   0xb   :  { %488 = vsyncadd [#allocation8], 4294967232 }
   0xc   :  { %489 = dma.done.wait [#allocation11], 128  }
   0xd   :  { %490 = vsyncadd [#allocation11], 4294967168  ;;  %v496_v0 = vmov 0   ;;  %vm151_vm0 = vcmask 27648   ;;  %vm177_vm1 = vcmask 1043456   ;;  %s497_s5 = smov 127   ;;  %v142_v21 = vlaneseq }
   0xe   :  { %377 = vset.pattern.permute.xlu0 %v496_v0  ;;  %378 = vset.pattern.permute.xlu2 %v496_v0  ;;  %v138_v1 = vld [vmem:[%s605_s0] sm:$0xf]  ;;  %v140_v2 = vld [vmem:[#allocation7] sm:$0xf]  ;;  %v141_v3 = vld [vmem:[#allocation10] sm:$0xf] }
   0xf   :  { %379 = vset.pattern.permute.xlu1 %v496_v0  ;;  %v152_v4 = vsel %vm151_vm0, %v138_v1, -inf  ;;  %v207_v5 = vmul.f32 %v141_v3, %v140_v2  ;;  %v188_v6 = vsel %vm177_vm1, %v141_v3, 0.0  ;;  %v139_v9 = vld [vmem:[%s606_s1] sm:$0xf]  ;;  %vm132_vm2 = vcmask 0   ;;  %s340_s17 = sshll.u32 %s611_s6, 4  ;;  %s341_s17 = int_to_ptr.hbm [resolvable:$true] %s340_s17 }
  0x10   :  { %153 = vmax.xlane.f32.xlu0 %v152_v4  ;;  %189 = vadd.xlane.f32.xlu2 %v188_v6  ;;  %v498_v16 = vmov 0.0   ;;  %v562_v25 = vshrl.u32 %v142_v21, 7  ;;  %v564_v26 = vand.u32 127, %v142_v21  ;;  %v244_v39 = vld [vmem:[%s609_s4] sm:$0xf]  ;;  %s499_s4 = smov [#allocation13]  }
  0x11   :  { %v208_v7 = vsub.f32 %v141_v3, %v207_v5  ;;  %133 = vst.msk [vmem:[#allocation2] sm:$0x1] %vm132_vm2, %v498_v16  ;;  %v247_v44 = vsel %vm177_vm1, %v244_v39, 0.0  ;;  %v245_v48 = vld [vmem:[#allocation12] sm:$0xf]  ;;  %s338_s14 = sshll.u32 %s499_s4, 4  ;;  %s339_s14 = int_to_ptr.vmem [resolvable:$true] %s338_s14 }
  0x12   :  { %134 = vst.msk [vmem:[#allocation3] sm:$0x1] %vm132_vm2, %v498_v16  ;;  %vm148_vm5 = vcmp.lt.s32.totalorder %v562_v25, 4  ;;  %v261_v50 = vsel %vm177_vm1, %v245_v48, 0.0  ;;  %vm277_vm9 = vcmp.eq.s32.totalorder %v562_v25, 0  ;;  %vm288_vm10 = vcmp.eq.s32.totalorder %v564_v26, 1 }
  0x13   :  { %223 = vrot.lane.b32.xlu1 %v208_v7, %s497_s5  ;;  %v210_v8 = vsel %vm177_vm1, %v208_v7, 0.0  ;;  %135 = vst.msk [vmem:[#allocation4] sm:$0x1] %vm132_vm2, %v498_v16  ;;  %v369_v38 = vsel %vm148_vm5, 1.0, %v498_v16  ;;  %vm278_vm11 = vcmp.eq.s32.totalorder %v564_v26, 0  ;;  %vm289_vm12 = vmand %vm277_vm9, %vm288_vm10  ;;  %vm299_vm13 = vcmp.eq.s32.totalorder %v564_v26, 2 }
  0x14   :  { %136 = vst.msk [vmem:[#allocation5] sm:$0x1] %vm132_vm2, %v498_v16  ;;  %vm279_vm14 = vmand %vm277_vm9, %vm278_vm11 }
  0x15   :  { %137 = vst.msk [vmem:[#allocation6] sm:$0x1] %vm132_vm2, %v498_v16  ;;  %vm300_vm15 = vmand %vm277_vm9, %vm299_vm13 }
  0x18   :  { %211 = vadd.xlane.f32.xlu2 %v210_v8 }
  0x19   :  { %v209_v54 = vld [vmem:[#allocation3] sm:$0x1] }
  0x1b   :  { %225 = vrot.lane.b32.xlu1 %v207_v5, %s497_s5 }
  0x24   :  { %167 = vperm.xlu0 %377, %v139_v9  }
  0x83   :  { %v553_v10 = vpop.xlane.xlu0 %153  ;;  %v190_v14 = vpop.xlane.xlu2 %189 }
  0x84   :  { %v155_v11 = vsub.f32 %v138_v1, %v553_v10  ;;  %v191_v15 = vadd.f32 1e-09, %v190_v14 }
  0x85   :  { %v224_v12 = vpop.permute.xlu1 %223 }
  0x86   :  { %v156_v13 = vmul.f32 1.442695, %v155_v11  ;;  %v227_v23 = vmul.f32 %v224_v12, %v207_v5  ;;  %v203_v28 = vand.u32 2147483648, %v191_v15  ;;  %vm197_vm3 = vweird.f32 %v191_v15 }
  0x87   :  { %v201_v30 = vand.u32 2147483647, %v191_v15 }
  0x88   :  { %385 = vpow2.f32 %v156_v13  ;;  %v204_v34 = vor.u32 1.1754944e-38, %v203_v28  ;;  %v174_v28 = vld [vmem:[#allocation2] sm:$0x1] }
  0x89   :  { %387 = vrcp.f32 %v191_v15  ;;  %vm202_vm8 = vcmp.eq.f32.partialorder %v201_v30, 8.507059e+37 }
  0x8b   :  { %v212_v42 = vpop.xlane.xlu2 %211 }
  0x8d   :  { %v226_v17 = vpop.permute.xlu1 %225 }
  0x8e   :  { %v386_v18 = vpop.eup %385  ;;  %v228_v19 = vmul.f32 %v226_v17, %v208_v7 }
  0x8f   :  { %v158_v20 = vsel %vm151_vm0, %v386_v18, 0.0  ;;  %v388_v22 = vpop.eup %387 }
  0x90   :  { %159 = vadd.xlane.f32.xlu2 %v158_v20  ;;  %v193_v24 = vmul.f32 %v388_v22, %v191_v15  ;;  %v229_v27 = vadd.f32 %v228_v19, %v227_v23  ;;  %vm198_vm4 = vweird.f32 %v388_v22 }
  0x91   :  { %vm199_vm7 = vmor %vm197_vm3, %vm198_vm4 }
  0x92   :  { %v194_v29 = vsub.f32 1.0, %v193_v24  ;;  %v230_v33 = vsel %vm177_vm1, %v229_v27, 0.0 }
  0x94   :  { %v195_v32 = vmul.f32 %v388_v22, %v194_v29 }
  0x96   :  { %v168_v31 = vpop.permute.xlu0 %167  ;;  %v196_v36 = vadd.f32 %v388_v22, %v195_v32 }
  0x97   :  { %vm169_vm6 = vcmp.eq.s32.totalorder %v564_v26, %v168_v31 }
  0x98   :  { %231 = vadd.xlane.f32.xlu2 %v230_v33  ;;  %v170_v35 = vsel %vm169_vm6, %v138_v1, 0.0  ;;  %v200_v40 = vsel %vm199_vm7, %v388_v22, %v196_v36 }
  0x99   :  { %v171_v37 = vsel %vm151_vm0, %v170_v35, 0.0  ;;  %v205_v41 = vsel %vm202_vm8, %v204_v34, %v200_v40  ;;  %v246_v35 = vld [vmem:[#allocation5] sm:$0x1]  ;;  %vm310_vm0 = vcmp.eq.s32.totalorder %v564_v26, 3 }
  0x9a   :  { %172 = vadd.xlane.f32.xlu1 %v171_v37  ;;  %v206_v43 = vmul.f32 %v369_v38, %v205_v41 }
  0x9c   :  { %v213_v45 = vmul.f32 %v212_v42, %v206_v43 }
  0x9e   :  { %v214_v46 = vsel %vm177_vm1, %v213_v45, 0.0 }
  0x9f   :  { %v215_v47 = vrot.slane %v214_v46, 4 }
  0xa0   :  { %248 = vadd.xlane.f32.xlu2 %v247_v44 }
  0xa1   :  { %v216_v49 = vadd.f32 %v215_v47, %v214_v46 }
  0xa3   :  { %v217_v51 = vrot.slane %v216_v49, 2 }
  0xa5   :  { %v218_v52 = vadd.f32 %v217_v51, %v216_v49 }
  0xa7   :  { %v219_v53 = vrot.slane %v218_v52, 1 }
  0xa8   :  { %262 = vadd.xlane.f32.xlu2 %v261_v50 }
  0xa9   :  { %v220_v55 = vadd.f32 %v219_v53, %v218_v52 }
  0xab   :  { %v221_v56 = vadd.f32 %v220_v55, %v209_v54 }
  0xad   :  { %222 = vst.msk [vmem:[#allocation3] sm:$0x1] %vm132_vm2, %v221_v56 }
  0xb4   :  { %v380_v57 = vld [vmem:[#allocation3] ss:$0 sm:$0xff] }
  0xc0   :  { %294 = vperm.xlu2 %378, %v380_v57  }
 0x103   :  { %v160_v58 = vpop.xlane.xlu2 %159 }
 0x104   :  { %389 = vlog2.f32 %v160_v58 }
 0x10a   :  { %v390_v59 = vpop.eup %389 }
 0x10b   :  { %v162_v60 = vmul.f32 0.6931472, %v390_v59  ;;  %v232_v61 = vpop.xlane.xlu2 %231 }
 0x10c   :  { %v234_v62 = vmul.f32 %v232_v61, %v206_v43  ;;  %v260_v43 = vld [vmem:[#allocation6] sm:$0x1] }
 0x10d   :  { %v163_v63 = vadd.f32 %v162_v60, %v553_v10  ;;  %v173_v0 = vpop.xlane.xlu1 %172  ;;  %v233_v10 = vld [vmem:[#allocation4] sm:$0x1] }
 0x10e   :  { %v235_v1 = vsel %vm177_vm1, %v234_v62, 0.0 }
 0x10f   :  { %v236_v2 = vrot.slane %v235_v1, 4  ;;  %v175_v3 = vsub.f32 %v163_v63, %v173_v0 }
 0x111   :  { %v237_v4 = vadd.f32 %v236_v2, %v235_v1  ;;  %v176_v5 = vmul.f32 %v369_v38, %v175_v3 }
 0x113   :  { %v238_v6 = vrot.slane %v237_v4, 2  ;;  %v178_v7 = vsel %vm177_vm1, %v176_v5, 0.0  ;;  %v249_v8 = vpop.xlane.xlu2 %248 }
 0x114   :  { %v179_v9 = vrot.slane %v178_v7, 4  ;;  %v250_v11 = vmul.f32 %v369_v38, %v249_v8 }
 0x115   :  { %v239_v12 = vadd.f32 %v238_v6, %v237_v4 }
 0x116   :  { %v180_v13 = vadd.f32 %v179_v9, %v178_v7  ;;  %v251_v14 = vsel %vm177_vm1, %v250_v11, 0.0 }
 0x117   :  { %v240_v15 = vrot.slane %v239_v12, 1  ;;  %v252_v16 = vrot.slane %v251_v14, 4 }
 0x118   :  { %v181_v17 = vrot.slane %v180_v13, 2 }
 0x119   :  { %v241_v18 = vadd.f32 %v240_v15, %v239_v12  ;;  %v253_v19 = vadd.f32 %v252_v16, %v251_v14 }
 0x11a   :  { %v182_v20 = vadd.f32 %v181_v17, %v180_v13 }
 0x11b   :  { %v242_v21 = vadd.f32 %v241_v18, %v233_v10  ;;  %v254_v22 = vrot.slane %v253_v19, 2  ;;  %v263_v23 = vpop.xlane.xlu2 %262 }
 0x11c   :  { %v183_v24 = vrot.slane %v182_v20, 1  ;;  %v264_v27 = vmul.f32 %v369_v38, %v263_v23 }
 0x11d   :  { %243 = vst.msk [vmem:[#allocation4] sm:$0x1] %vm132_vm2, %v242_v21  ;;  %v255_v29 = vadd.f32 %v254_v22, %v253_v19 }
 0x11e   :  { %v184_v30 = vadd.f32 %v183_v24, %v182_v20  ;;  %v265_v31 = vsel %vm177_vm1, %v264_v27, 0.0  ;;  %vm321_vm1 = vcmp.eq.s32.totalorder %v564_v26, 4 }
 0x11f   :  { %v256_v32 = vrot.slane %v255_v29, 1  ;;  %v266_v33 = vrot.slane %v265_v31, 4  ;;  %vm322_vm3 = vmand %vm277_vm9, %vm321_vm1 }
 0x120   :  { %v185_v34 = vadd.f32 %v184_v30, %v174_v28 }
 0x121   :  { %v257_v36 = vadd.f32 %v256_v32, %v255_v29  ;;  %v267_v37 = vadd.f32 %v266_v33, %v265_v31 }
 0x122   :  { %187 = vst.msk [vmem:[#allocation2] sm:$0x1] %vm132_vm2, %v185_v34 }
 0x123   :  { %v258_v39 = vadd.f32 %v257_v36, %v246_v35  ;;  %v268_v40 = vrot.slane %v267_v37, 2  ;;  %v295_v50 = vpop.permute.xlu2 %294 }
 0x124   :  { %v381_v41 = vld [vmem:[#allocation4] ss:$0 sm:$0xff]  ;;  %v297_v52 = vsel %vm289_vm12, %v295_v50, 0.0 }
 0x125   :  { %259 = vst.msk [vmem:[#allocation5] sm:$0x1] %vm132_vm2, %v258_v39  ;;  %v269_v38 = vadd.f32 %v268_v40, %v267_v37  ;;  %305 = vperm.xlu0 %377, %v381_v41  }
 0x127   :  { %v270_v42 = vrot.slane %v269_v38, 1 }
 0x129   :  { %v271_v44 = vadd.f32 %v270_v42, %v269_v38  ;;  %v383_v47 = vld [vmem:[#allocation2] ss:$0 sm:$0xff] }
 0x12b   :  { %v272_v45 = vadd.f32 %v271_v44, %v260_v43 }
 0x12c   :  { %v382_v46 = vld [vmem:[#allocation5] ss:$0 sm:$0xff] }
 0x12d   :  { %273 = vst.msk [vmem:[#allocation6] sm:$0x1] %vm132_vm2, %v272_v45  ;;  %316 = vperm.xlu1 %379, %v382_v46   ;;  %284 = vperm.xlu0 %377, %v383_v47   ;;  %vm311_vm2 = vmand %vm277_vm9, %vm310_vm0 }
 0x134   :  { %v384_v48 = vld [vmem:[#allocation6] ss:$0 sm:$0xff] }
 0x135   :  { %327 = vperm.xlu0 %377, %v384_v48  }
 0x197   :  { %v306_v49 = vpop.permute.xlu0 %305 }
 0x198   :  { %v308_v55 = vsel %vm300_vm15, %v306_v49, 0.0 }
 0x19f   :  { %v285_v51 = vpop.permute.xlu0 %284  ;;  %v317_v56 = vpop.permute.xlu1 %316 }
 0x1a0   :  { %v287_v53 = vsel %vm279_vm14, %v285_v51, 0.0  ;;  %v319_v58 = vsel %vm311_vm2, %v317_v56, 0.0 }
 0x1a1   :  { %v298_v54 = vadd.f32 %v297_v52, %v287_v53 }
 0x1a3   :  { %v309_v57 = vadd.f32 %v308_v55, %v298_v54 }
 0x1a5   :  { %v320_v59 = vadd.f32 %v319_v58, %v309_v57 }
 0x1a7   :  { %v328_v60 = vpop.permute.xlu0 %327 }
 0x1a8   :  { %v330_v61 = vsel %vm322_vm3, %v328_v60, 0.0 }
 0x1a9   :  { %v331_v62 = vadd.f32 %v330_v61, %v320_v59 }
 0x1ab   :  { %332 = vst [vmem:[#allocation13] sm:$0xff] %v331_v62 }
 0x1ac   :  { %343 = dma.vmem_to_hbm [thread:$0]  %s339_s14, 128, %s341_s17, [#allocation9]  }
 0x1ad   :  { %491 = dma.done.wait [#allocation9], 128  }
 0x1ae   :  { %492 = vsyncadd [#allocation9], 4294967168 }
 0x1af   :  { %348 = vsyncpa [#allocation8], 1 }
 0x1b0   :  { %349 = vsyncpa [#allocation11], 1 }
 0x1b1   :  { %350 = vsyncpa [#allocation9], 1 }

</bundles_post_ra>
